<compile_context>
chip_gen: v7x
topology: tpu7x:2x2x1
jax: 0.10.0
libtpu: 0.0.40
codegen_flags: <defaults>
</compile_context>

<pallas_src>
import functools
import math

import jax
import jax.numpy as jnp
from jax.experimental import pallas as pl
from jax.experimental.pallas import tpu as pltpu

EPS = 1e-12


def _layernorm(x, gamma, beta):
    u = jnp.mean(x, axis=-1, keepdims=True)
    s = jnp.mean((x - u) ** 2, axis=-1, keepdims=True)
    xn = (x - u) * jax.lax.rsqrt(s + EPS)
    return xn * gamma + beta


def layer_kernel(x_ref, crci_ref, drdi_ref, wr_ref, wi_ref,
                 g1_ref, be1_ref, w1_ref, bb1_ref, w2_ref, bb2_ref,
                 g2_ref, be2_ref, o_ref, *, matmul_dtype):
    Bt, S, H = x_ref.shape
    Fp = wr_ref.shape[0]
    mm = matmul_dtype

    x = x_ref[...].astype(jnp.float32)                                # (Bt,S,H)

    # ---- FilterLayer: fused real/imag DFT -> complex filter -> inverse DFT ---
    # Forward DFT (rfft, ortho): one batched matmul with stacked [Cr; Ci].
    cc = jnp.broadcast_to(crci_ref[...], (Bt, 2 * Fp, S))
    xri = jnp.einsum('bfs,bsh->bfh', cc, x.astype(mm),
                     preferred_element_type=jnp.float32)              # (Bt,2Fp,H)
    xr = xri[:, :Fp, :]
    xi = xri[:, Fp:, :]
    wr = wr_ref[...]                                                  # (Fp, H)
    wi = wi_ref[...]
    yr = xr * wr - xi * wi
    yi = xr * wi + xi * wr
    yri = jnp.concatenate([yr, yi], axis=1)                           # (Bt,2Fp,H)
    # Inverse DFT (irfft, ortho, Hermitian fold baked into Dr/Di): one matmul.
    dd = jnp.broadcast_to(drdi_ref[...], (Bt, S, 2 * Fp))
    y = jnp.einsum('bsf,bfh->bsh', dd, yri.astype(mm),
                   preferred_element_type=jnp.float32)                # (Bt,S,H)

    # dropout == identity (eval mode); LayerNorm over hidden with residual.
    h = _layernorm((y + x).reshape(Bt * S, H), g1_ref[...], be1_ref[...])

    # ---- Intermediate: Linear -> GELU(exact erf) -> Linear -> LN(residual) ---
    t = jnp.dot(h.astype(mm), w1_ref[...],
                preferred_element_type=jnp.float32) + bb1_ref[...]
    t = 0.5 * t * (1.0 + jax.lax.erf(t * (1.0 / math.sqrt(2.0))))
    t = jnp.dot(t.astype(mm), w2_ref[...],
                preferred_element_type=jnp.float32) + bb2_ref[...]
    out = _layernorm(t + h, g2_ref[...], be2_ref[...])                # (Bt*S,H)

    o_ref[...] = out.reshape(Bt, S, H).astype(o_ref.dtype)


def _dft_matrices(S, Fp):
    """Stacked real matrices implementing ortho rfft / irfft along the seq axis.

    Returns CrCi (2*Fp, S) and DrDi (S, 2*Fp); frequency axis zero-padded to Fp.
    """
    F = S // 2 + 1
    t = jnp.arange(S, dtype=jnp.float32)
    f = jnp.arange(F, dtype=jnp.float32)
    theta = 2.0 * jnp.pi * f[:, None] * t[None, :] / S                # (F, S)
    inv_sqrt = 1.0 / math.sqrt(S)
    Cr = jnp.cos(theta) * inv_sqrt                                    # (F, S)
    Ci = -jnp.sin(theta) * inv_sqrt                                   # (F, S)
    # Hermitian fold weights: DC once; Nyquist once only when S is even.
    c = jnp.ones((F,), jnp.float32)
    if S % 2 == 0:
        c = c.at[1:F - 1].set(2.0)
    else:
        c = c.at[1:].set(2.0)
    Dr = (c[None, :] * jnp.cos(theta).T) * inv_sqrt                   # (S, F)
    Di = (-c[None, :] * jnp.sin(theta).T) * inv_sqrt                  # (S, F)
    # Zero-pad the frequency axis to a sublane multiple; padded bins are inert.
    pad = Fp - F
    Cr = jnp.pad(Cr, ((0, pad), (0, 0)))
    Ci = jnp.pad(Ci, ((0, pad), (0, 0)))
    Dr = jnp.pad(Dr, ((0, 0), (0, pad)))
    Di = jnp.pad(Di, ((0, 0), (0, pad)))
    CrCi = jnp.concatenate([Cr, Ci], axis=0)                          # (2Fp, S)
    DrDi = jnp.concatenate([Dr, Di], axis=1)                          # (S, 2Fp)
    return CrCi, DrDi


def _pick_block_batch(B, S, target_rows):
    """Largest divisor of B whose fused row count Bt*S stays <= target_rows."""
    best = 1
    for bt in range(1, B + 1):
        if B % bt == 0 and bt * S <= max(target_rows, S):
            best = bt
    return best


def fmlp_layer(x, params, *, matmul_dtype=jnp.float32, block_rows_target=256):
    B, S, H = x.shape
    F = S // 2 + 1
    Fp = 8 * pl.cdiv(F, 8)
    CrCi, DrDi = _dft_matrices(S, Fp)
    (Wr, Wi, g1, be1, W1, bb1, W2, bb2, g2, be2) = params
    I = W1.shape[1]

    # Pad the complex filter weights along the frequency axis to match Fp.
    Wr = jnp.pad(Wr, ((0, Fp - F), (0, 0)))
    Wi = jnp.pad(Wi, ((0, Fp - F), (0, 0)))

    # MXU operand dtype (bf16 recommended on v6e/v7x; accumulation stays f32).
    CrCi = CrCi.astype(matmul_dtype)
    DrDi = DrDi.astype(matmul_dtype)
    W1m = W1.astype(matmul_dtype)
    W2m = W2.astype(matmul_dtype)

    # Fuse Bt sequences per grid step so the FFN matmul M-dim is Bt*S.
    Bt = _pick_block_batch(B, S, block_rows_target)

    fixed = lambda shape: pl.BlockSpec(shape, lambda b: (0, 0))
    kernel = functools.partial(layer_kernel, matmul_dtype=matmul_dtype)

    return pl.pallas_call(
        kernel,
        out_shape=jax.ShapeDtypeStruct((B, S, H), x.dtype),
        grid=(B // Bt,),
        in_specs=[
            pl.BlockSpec((Bt, S, H), lambda b: (b, 0, 0)),   # x block
            fixed((2 * Fp, S)),                              # [Cr; Ci]
            fixed((S, 2 * Fp)),                              # [Dr | Di]
            fixed((Fp, H)),                                  # filter weight (real)
            fixed((Fp, H)),                                  # filter weight (imag)
            fixed((1, H)),                                   # LN1 gamma
            fixed((1, H)),                                   # LN1 beta
            fixed((H, I)),                                   # dense_1 weight
            fixed((1, I)),                                   # dense_1 bias
            fixed((I, H)),                                   # dense_2 weight
            fixed((1, H)),                                   # dense_2 bias
            fixed((1, H)),                                   # LN2 gamma
            fixed((1, H)),                                   # LN2 beta
        ],
        out_specs=pl.BlockSpec((Bt, S, H), lambda b: (b, 0, 0)),
        compiler_params=pltpu.CompilerParams(
            dimension_semantics=("parallel",)),
    )(x, CrCi, DrDi, Wr, Wi, g1, be1, W1m, bb1, W2m, bb2, g2, be2)


def reference(x, params):
    """Pure-JAX reference mirroring the PyTorch forward (eval mode)."""
    (Wr, Wi, g1, be1, W1, bb1, W2, bb2, g2, be2) = params
    S = x.shape[1]
    Xc = jnp.fft.rfft(x, axis=1, norm="ortho")
    Y = Xc * (Wr + 1j * Wi)[None]
    y = jnp.fft.irfft(Y, n=S, axis=1, norm="ortho")
    h = _layernorm(y + x, g1, be1)
    t = h @ W1 + bb1
    t = 0.5 * t * (1.0 + jax.lax.erf(t * (1.0 / math.sqrt(2.0))))
    t = t @ W2 + bb2
    return _layernorm(t + h, g2, be2)


if __name__ == "__main__":
    B, S, H = 2, 8, 32           # batch, max_seq_length, hidden_size
    F = S // 2 + 1

    key = jax.random.PRNGKey(0)
    kx, kw, k1, k2 = jax.random.split(key, 4)

    x = jax.random.normal(kx, (B, S, H), jnp.float32)

    # complex_weight ~ randn(1, F, H, 2) * 0.02
    cw = jax.random.normal(kw, (F, H, 2), jnp.float32) * 0.02
    Wr, Wi = cw[..., 0], cw[..., 1]
    # LayerNorms: weight=1, bias=0
    g1 = jnp.ones((1, H), jnp.float32)
    be1 = jnp.zeros((1, H), jnp.float32)
    g2 = jnp.ones((1, H), jnp.float32)
    be2 = jnp.zeros((1, H), jnp.float32)
    # dense_1: hidden -> 4*hidden ; dense_2: 4*hidden -> hidden
    W1 = jax.random.normal(k1, (H, 4 * H), jnp.float32) * 0.02
    bb1 = jnp.zeros((1, 4 * H), jnp.float32)
    W2 = jax.random.normal(k2, (4 * H, H), jnp.float32) * 0.02
    bb2 = jnp.zeros((1, H), jnp.float32)

    params = (Wr, Wi, g1, be1, W1, bb1, W2, bb2, g2, be2)

    ref = reference(x, params)

    # f32 matmul path: must match the reference tightly.
    out = jax.block_until_ready(fmlp_layer(x, params))
    assert out.shape == (B, S, H)
    assert jnp.allclose(out, ref, atol=1e-4, rtol=1e-4), float(
        jnp.max(jnp.abs(out - ref)))

    # bf16 MXU-operand path (v6e/v7x recommendation): looser tolerance.
    out_bf16 = jax.block_until_ready(
        fmlp_layer(x, params, matmul_dtype=jnp.bfloat16))
    assert jnp.allclose(out_bf16, ref, atol=5e-2, rtol=5e-2), float(
        jnp.max(jnp.abs(out_bf16 - ref)))

    print("KERNEL_OK")
</pallas_src>

<mosaic_0001>
module attributes {stable_mosaic.version = 11 : i64} {
  func.func @layer_kernel(%arg0: i32, %arg1: memref<2x8x32xf32, #tpu.memory_space<vmem>>, %arg2: memref<16x8xf32, #tpu.memory_space<vmem>>, %arg3: memref<8x16xf32, #tpu.memory_space<vmem>>, %arg4: memref<8x32xf32, #tpu.memory_space<vmem>>, %arg5: memref<8x32xf32, #tpu.memory_space<vmem>>, %arg6: memref<1x32xf32, #tpu.memory_space<vmem>>, %arg7: memref<1x32xf32, #tpu.memory_space<vmem>>, %arg8: memref<32x128xf32, #tpu.memory_space<vmem>>, %arg9: memref<1x128xf32, #tpu.memory_space<vmem>>, %arg10: memref<128x32xf32, #tpu.memory_space<vmem>>, %arg11: memref<1x32xf32, #tpu.memory_space<vmem>>, %arg12: memref<1x32xf32, #tpu.memory_space<vmem>>, %arg13: memref<1x32xf32, #tpu.memory_space<vmem>>, %arg14: memref<2x8x32xf32, #tpu.memory_space<vmem>>) attributes {dimension_semantics = [#tpu.dimension_semantics<parallel>], iteration_bounds = array<i64: 1>, scalar_prefetch = 0 : i64, scratch_operands = 0 : i64, tpu.core_type = #tpu.core_type<tc>, window_params = [{transform_indices = @transform_0, window_bounds = array<i64: 2, 8, 32>}, {pipeline_mode = #tpu.pipeline_mode<synchronous>, transform_indices = @transform_1, window_bounds = array<i64: 16, 8>}, {pipeline_mode = #tpu.pipeline_mode<synchronous>, transform_indices = @transform_2, window_bounds = array<i64: 8, 16>}, {pipeline_mode = #tpu.pipeline_mode<synchronous>, transform_indices = @transform_3, window_bounds = array<i64: 8, 32>}, {pipeline_mode = #tpu.pipeline_mode<synchronous>, transform_indices = @transform_4, window_bounds = array<i64: 8, 32>}, {pipeline_mode = #tpu.pipeline_mode<synchronous>, transform_indices = @transform_5, window_bounds = array<i64: 1, 32>}, {pipeline_mode = #tpu.pipeline_mode<synchronous>, transform_indices = @transform_6, window_bounds = array<i64: 1, 32>}, {pipeline_mode = #tpu.pipeline_mode<synchronous>, transform_indices = @transform_7, window_bounds = array<i64: 32, 128>}, {pipeline_mode = #tpu.pipeline_mode<synchronous>, transform_indices = @transform_8, window_bounds = array<i64: 1, 128>}, {pipeline_mode = #tpu.pipeline_mode<synchronous>, transform_indices = @transform_9, window_bounds = array<i64: 128, 32>}, {pipeline_mode = #tpu.pipeline_mode<synchronous>, transform_indices = @transform_10, window_bounds = array<i64: 1, 32>}, {pipeline_mode = #tpu.pipeline_mode<synchronous>, transform_indices = @transform_11, window_bounds = array<i64: 1, 32>}, {pipeline_mode = #tpu.pipeline_mode<synchronous>, transform_indices = @transform_12, window_bounds = array<i64: 1, 32>}, {transform_indices = @transform_13, window_bounds = array<i64: 2, 8, 32>}]} {
    %c0 = arith.constant 0 : index
    %c0_0 = arith.constant 0 : index
    %c0_1 = arith.constant 0 : index
    %0 = vector.load %arg1[%c0, %c0_0, %c0_1] : memref<2x8x32xf32, #tpu.memory_space<vmem>>, vector<2x8x32xf32>
    %c0_2 = arith.constant 0 : index
    %c0_3 = arith.constant 0 : index
    %1 = vector.load %arg2[%c0_2, %c0_3] : memref<16x8xf32, #tpu.memory_space<vmem>>, vector<16x8xf32>
    %2 = vector.shape_cast %1 : vector<16x8xf32> to vector<1x16x8xf32>
    %3 = vector.broadcast %2 : vector<1x16x8xf32> to vector<2x16x8xf32>
    "tpu.trace_start"() <{level = 10 : i32, message = "bfs,bsh->bfh"}> : () -> ()
    %cst = arith.constant dense<0.000000e+00> : vector<2x16x32xf32>
    %4 = tpu.matmul %3, %0, %cst {dimension_numbers = #tpu.dot_dimension_numbers<[2], [1], [1], [2], [0, 0, 0, 1, 1, 2], [0], [0]>} : vector<2x16x8xf32>, vector<2x8x32xf32>, vector<2x16x32xf32> -> vector<2x16x32xf32>
    "tpu.trace_stop"() : () -> ()
    %5 = vector.extract_strided_slice %4 {offsets = [0, 0, 0], sizes = [2, 8, 32], strides = [1, 1, 1]} : vector<2x16x32xf32> to vector<2x8x32xf32>
    %6 = vector.extract_strided_slice %4 {offsets = [0, 8, 0], sizes = [2, 8, 32], strides = [1, 1, 1]} : vector<2x16x32xf32> to vector<2x8x32xf32>
    %c0_4 = arith.constant 0 : index
    %c0_5 = arith.constant 0 : index
    %7 = vector.load %arg4[%c0_4, %c0_5] : memref<8x32xf32, #tpu.memory_space<vmem>>, vector<8x32xf32>
    %c0_6 = arith.constant 0 : index
    %c0_7 = arith.constant 0 : index
    %8 = vector.load %arg5[%c0_6, %c0_7] : memref<8x32xf32, #tpu.memory_space<vmem>>, vector<8x32xf32>
    %9 = vector.shape_cast %7 : vector<8x32xf32> to vector<1x8x32xf32>
    %10 = vector.broadcast %9 : vector<1x8x32xf32> to vector<2x8x32xf32>
    %11 = arith.mulf %5, %10 : vector<2x8x32xf32>
    %12 = vector.shape_cast %8 : vector<8x32xf32> to vector<1x8x32xf32>
    %13 = vector.broadcast %12 : vector<1x8x32xf32> to vector<2x8x32xf32>
    %14 = arith.mulf %6, %13 : vector<2x8x32xf32>
    %15 = arith.subf %11, %14 : vector<2x8x32xf32>
    %16 = vector.shape_cast %8 : vector<8x32xf32> to vector<1x8x32xf32>
    %17 = vector.broadcast %16 : vector<1x8x32xf32> to vector<2x8x32xf32>
    %18 = arith.mulf %5, %17 : vector<2x8x32xf32>
    %19 = vector.shape_cast %7 : vector<8x32xf32> to vector<1x8x32xf32>
    %20 = vector.broadcast %19 : vector<1x8x32xf32> to vector<2x8x32xf32>
    %21 = arith.mulf %6, %20 : vector<2x8x32xf32>
    %22 = arith.addf %18, %21 : vector<2x8x32xf32>
    %23 = tpu.concatenate %15, %22 in 1 : vector<2x8x32xf32>, vector<2x8x32xf32> -> vector<2x16x32xf32>
    %c0_8 = arith.constant 0 : index
    %c0_9 = arith.constant 0 : index
    %24 = vector.load %arg3[%c0_8, %c0_9] : memref<8x16xf32, #tpu.memory_space<vmem>>, vector<8x16xf32>
    %25 = vector.shape_cast %24 : vector<8x16xf32> to vector<1x8x16xf32>
    %26 = vector.broadcast %25 : vector<1x8x16xf32> to vector<2x8x16xf32>
    "tpu.trace_start"() <{level = 10 : i32, message = "bsf,bfh->bsh"}> : () -> ()
    %cst_10 = arith.constant dense<0.000000e+00> : vector<2x8x32xf32>
    %27 = tpu.matmul %26, %23, %cst_10 {dimension_numbers = #tpu.dot_dimension_numbers<[2], [1], [1], [2], [0, 0, 0, 1, 1, 2], [0], [0]>} : vector<2x8x16xf32>, vector<2x16x32xf32>, vector<2x8x32xf32> -> vector<2x8x32xf32>
    "tpu.trace_stop"() : () -> ()
    %28 = arith.addf %27, %0 : vector<2x8x32xf32>
    %29 = vector.shape_cast %28 : vector<2x8x32xf32> to vector<16x32xf32>
    %c0_11 = arith.constant 0 : index
    %c0_12 = arith.constant 0 : index
    %30 = vector.load %arg6[%c0_11, %c0_12] : memref<1x32xf32, #tpu.memory_space<vmem>>, vector<1x32xf32>
    %c0_13 = arith.constant 0 : index
    %c0_14 = arith.constant 0 : index
    %31 = vector.load %arg7[%c0_13, %c0_14] : memref<1x32xf32, #tpu.memory_space<vmem>>, vector<1x32xf32>
    %cst_15 = arith.constant dense<0.000000e+00> : vector<16xf32>
    %32 = vector.multi_reduction <add>, %29, %cst_15 [1] : vector<16x32xf32> to vector<16xf32>
    %33 = vector.shape_cast %32 : vector<16xf32> to vector<16x1xf32>
    %cst_16 = arith.constant 3.200000e+01 : f32
    %34 = vector.broadcast %cst_16 : f32 to vector<16x1xf32>
    %35 = arith.divf %33, %34 : vector<16x1xf32>
    %36 = vector.broadcast %35 : vector<16x1xf32> to vector<16x32xf32>
    %37 = arith.subf %29, %36 : vector<16x32xf32>
    %38 = arith.mulf %37, %37 : vector<16x32xf32>
    %cst_17 = arith.constant dense<0.000000e+00> : vector<16xf32>
    %39 = vector.multi_reduction <add>, %38, %cst_17 [1] : vector<16x32xf32> to vector<16xf32>
    %40 = vector.shape_cast %39 : vector<16xf32> to vector<16x1xf32>
    %cst_18 = arith.constant 3.200000e+01 : f32
    %41 = vector.broadcast %cst_18 : f32 to vector<16x1xf32>
    %42 = arith.divf %40, %41 : vector<16x1xf32>
    %43 = vector.broadcast %35 : vector<16x1xf32> to vector<16x32xf32>
    %44 = arith.subf %29, %43 : vector<16x32xf32>
    %cst_19 = arith.constant 9.99999996E-13 : f32
    %45 = vector.broadcast %cst_19 : f32 to vector<16x1xf32>
    %46 = arith.addf %42, %45 : vector<16x1xf32>
    %47 = math.rsqrt %46 : vector<16x1xf32>
    %48 = vector.broadcast %47 : vector<16x1xf32> to vector<16x32xf32>
    %49 = arith.mulf %44, %48 : vector<16x32xf32>
    %50 = vector.broadcast %30 : vector<1x32xf32> to vector<16x32xf32>
    %51 = arith.mulf %49, %50 : vector<16x32xf32>
    %52 = vector.broadcast %31 : vector<1x32xf32> to vector<16x32xf32>
    %53 = arith.addf %51, %52 : vector<16x32xf32>
    %c0_20 = arith.constant 0 : index
    %c0_21 = arith.constant 0 : index
    %54 = vector.load %arg8[%c0_20, %c0_21] : memref<32x128xf32, #tpu.memory_space<vmem>>, vector<32x128xf32>
    %cst_22 = arith.constant dense<0.000000e+00> : vector<16x128xf32>
    %55 = tpu.matmul %53, %54, %cst_22 {dimension_numbers = #tpu.dot_dimension_numbers<[1], [0], [0], [1], [0, 0, 1, 1], [], []>} : vector<16x32xf32>, vector<32x128xf32>, vector<16x128xf32> -> vector<16x128xf32>
    %c0_23 = arith.constant 0 : index
    %c0_24 = arith.constant 0 : index
    %56 = vector.load %arg9[%c0_23, %c0_24] : memref<1x128xf32, #tpu.memory_space<vmem>>, vector<1x128xf32>
    %57 = vector.broadcast %56 : vector<1x128xf32> to vector<16x128xf32>
    %58 = arith.addf %55, %57 : vector<16x128xf32>
    %cst_25 = arith.constant 5.000000e-01 : f32
    %59 = vector.broadcast %cst_25 : f32 to vector<16x128xf32>
    %60 = arith.mulf %59, %58 : vector<16x128xf32>
    %cst_26 = arith.constant 0.707106769 : f32
    %61 = vector.broadcast %cst_26 : f32 to vector<16x128xf32>
    %62 = arith.mulf %58, %61 : vector<16x128xf32>
    %63 = math.erf %62 : vector<16x128xf32>
    %cst_27 = arith.constant 1.000000e+00 : f32
    %64 = vector.broadcast %cst_27 : f32 to vector<16x128xf32>
    %65 = arith.addf %64, %63 : vector<16x128xf32>
    %66 = arith.mulf %60, %65 : vector<16x128xf32>
    %c0_28 = arith.constant 0 : index
    %c0_29 = arith.constant 0 : index
    %67 = vector.load %arg10[%c0_28, %c0_29] : memref<128x32xf32, #tpu.memory_space<vmem>>, vector<128x32xf32>
    %cst_30 = arith.constant dense<0.000000e+00> : vector<16x32xf32>
    %68 = tpu.matmul %66, %67, %cst_30 {dimension_numbers = #tpu.dot_dimension_numbers<[1], [0], [0], [1], [0, 0, 1, 1], [], []>} : vector<16x128xf32>, vector<128x32xf32>, vector<16x32xf32> -> vector<16x32xf32>
    %c0_31 = arith.constant 0 : index
    %c0_32 = arith.constant 0 : index
    %69 = vector.load %arg11[%c0_31, %c0_32] : memref<1x32xf32, #tpu.memory_space<vmem>>, vector<1x32xf32>
    %70 = vector.broadcast %69 : vector<1x32xf32> to vector<16x32xf32>
    %71 = arith.addf %68, %70 : vector<16x32xf32>
    %72 = arith.addf %71, %53 : vector<16x32xf32>
    %c0_33 = arith.constant 0 : index
    %c0_34 = arith.constant 0 : index
    %73 = vector.load %arg12[%c0_33, %c0_34] : memref<1x32xf32, #tpu.memory_space<vmem>>, vector<1x32xf32>
    %c0_35 = arith.constant 0 : index
    %c0_36 = arith.constant 0 : index
    %74 = vector.load %arg13[%c0_35, %c0_36] : memref<1x32xf32, #tpu.memory_space<vmem>>, vector<1x32xf32>
    %cst_37 = arith.constant dense<0.000000e+00> : vector<16xf32>
    %75 = vector.multi_reduction <add>, %72, %cst_37 [1] : vector<16x32xf32> to vector<16xf32>
    %76 = vector.shape_cast %75 : vector<16xf32> to vector<16x1xf32>
    %cst_38 = arith.constant 3.200000e+01 : f32
    %77 = vector.broadcast %cst_38 : f32 to vector<16x1xf32>
    %78 = arith.divf %76, %77 : vector<16x1xf32>
    %79 = vector.broadcast %78 : vector<16x1xf32> to vector<16x32xf32>
    %80 = arith.subf %72, %79 : vector<16x32xf32>
    %81 = arith.mulf %80, %80 : vector<16x32xf32>
    %cst_39 = arith.constant dense<0.000000e+00> : vector<16xf32>
    %82 = vector.multi_reduction <add>, %81, %cst_39 [1] : vector<16x32xf32> to vector<16xf32>
    %83 = vector.shape_cast %82 : vector<16xf32> to vector<16x1xf32>
    %cst_40 = arith.constant 3.200000e+01 : f32
    %84 = vector.broadcast %cst_40 : f32 to vector<16x1xf32>
    %85 = arith.divf %83, %84 : vector<16x1xf32>
    %86 = vector.broadcast %78 : vector<16x1xf32> to vector<16x32xf32>
    %87 = arith.subf %72, %86 : vector<16x32xf32>
    %cst_41 = arith.constant 9.99999996E-13 : f32
    %88 = vector.broadcast %cst_41 : f32 to vector<16x1xf32>
    %89 = arith.addf %85, %88 : vector<16x1xf32>
    %90 = math.rsqrt %89 : vector<16x1xf32>
    %91 = vector.broadcast %90 : vector<16x1xf32> to vector<16x32xf32>
    %92 = arith.mulf %87, %91 : vector<16x32xf32>
    %93 = vector.broadcast %73 : vector<1x32xf32> to vector<16x32xf32>
    %94 = arith.mulf %92, %93 : vector<16x32xf32>
    %95 = vector.broadcast %74 : vector<1x32xf32> to vector<16x32xf32>
    %96 = arith.addf %94, %95 : vector<16x32xf32>
    %97 = vector.shape_cast %96 : vector<16x32xf32> to vector<2x8x32xf32>
    %c0_42 = arith.constant 0 : index
    %c0_43 = arith.constant 0 : index
    %c0_44 = arith.constant 0 : index
    %98 = vector.load %arg14[%c0_42, %c0_43, %c0_44] : memref<2x8x32xf32, #tpu.memory_space<vmem>>, vector<2x8x32xf32>
    tpu.vector_store %arg14[%c0_42, %c0_43, %c0_44], %97 {strides = array<i32>} : memref<2x8x32xf32, #tpu.memory_space<vmem>>, vector<2x8x32xf32>,
    return
  }
  func.func @transform_0(%arg0: i32) -> (i32, i32, i32) {
    %c0_i32 = arith.constant 0 : i32
    %c0_i32_0 = arith.constant 0 : i32
    %c0_i32_1 = arith.constant 0 : i32
    return %arg0, %c0_i32, %c0_i32_0 : i32, i32, i32
  }
  func.func @transform_1(%arg0: i32) -> (i32, i32) {
    %c0_i32 = arith.constant 0 : i32
    %c0_i32_0 = arith.constant 0 : i32
    %c0_i32_1 = arith.constant 0 : i32
    return %c0_i32, %c0_i32_0 : i32, i32
  }
  func.func @transform_2(%arg0: i32) -> (i32, i32) {
    %c0_i32 = arith.constant 0 : i32
    %c0_i32_0 = arith.constant 0 : i32
    %c0_i32_1 = arith.constant 0 : i32
    return %c0_i32, %c0_i32_0 : i32, i32
  }
  func.func @transform_3(%arg0: i32) -> (i32, i32) {
    %c0_i32 = arith.constant 0 : i32
    %c0_i32_0 = arith.constant 0 : i32
    %c0_i32_1 = arith.constant 0 : i32
    return %c0_i32, %c0_i32_0 : i32, i32
  }
  func.func @transform_4(%arg0: i32) -> (i32, i32) {
    %c0_i32 = arith.constant 0 : i32
    %c0_i32_0 = arith.constant 0 : i32
    %c0_i32_1 = arith.constant 0 : i32
    return %c0_i32, %c0_i32_0 : i32, i32
  }
  func.func @transform_5(%arg0: i32) -> (i32, i32) {
    %c0_i32 = arith.constant 0 : i32
    %c0_i32_0 = arith.constant 0 : i32
    %c0_i32_1 = arith.constant 0 : i32
    return %c0_i32, %c0_i32_0 : i32, i32
  }
  func.func @transform_6(%arg0: i32) -> (i32, i32) {
    %c0_i32 = arith.constant 0 : i32
    %c0_i32_0 = arith.constant 0 : i32
    %c0_i32_1 = arith.constant 0 : i32
    return %c0_i32, %c0_i32_0 : i32, i32
  }
  func.func @transform_7(%arg0: i32) -> (i32, i32) {
    %c0_i32 = arith.constant 0 : i32
    %c0_i32_0 = arith.constant 0 : i32
    %c0_i32_1 = arith.constant 0 : i32
    return %c0_i32, %c0_i32_0 : i32, i32
  }
  func.func @transform_8(%arg0: i32) -> (i32, i32) {
    %c0_i32 = arith.constant 0 : i32
    %c0_i32_0 = arith.constant 0 : i32
    %c0_i32_1 = arith.constant 0 : i32
    return %c0_i32, %c0_i32_0 : i32, i32
  }
  func.func @transform_9(%arg0: i32) -> (i32, i32) {
    %c0_i32 = arith.constant 0 : i32
    %c0_i32_0 = arith.constant 0 : i32
    %c0_i32_1 = arith.constant 0 : i32
    return %c0_i32, %c0_i32_0 : i32, i32
  }
  func.func @transform_10(%arg0: i32) -> (i32, i32) {
    %c0_i32 = arith.constant 0 : i32
    %c0_i32_0 = arith.constant 0 : i32
    %c0_i32_1 = arith.constant 0 : i32
    return %c0_i32, %c0_i32_0 : i32, i32
  }
  func.func @transform_11(%arg0: i32) -> (i32, i32) {
    %c0_i32 = arith.constant 0 : i32
    %c0_i32_0 = arith.constant 0 : i32
    %c0_i32_1 = arith.constant 0 : i32
    return %c0_i32, %c0_i32_0 : i32, i32
  }
  func.func @transform_12(%arg0: i32) -> (i32, i32) {
    %c0_i32 = arith.constant 0 : i32
    %c0_i32_0 = arith.constant 0 : i32
    %c0_i32_1 = arith.constant 0 : i32
    return %c0_i32, %c0_i32_0 : i32, i32
  }
  func.func @transform_13(%arg0: i32) -> (i32, i32, i32) {
    %c0_i32 = arith.constant 0 : i32
    %c0_i32_0 = arith.constant 0 : i32
    %c0_i32_1 = arith.constant 0 : i32
    return %arg0, %c0_i32, %c0_i32_0 : i32, i32, i32
  }
}

</mosaic_0001>

<bundles_post_ra>
// kernel: tpu_custom_call.1
= control target key start
LH: loop header
LB: loop body
LE: loop exit
PB: predicated region body
PF: predicated region fallthrough
CT: control target
= control target key end

     0   :  { %vm49_vm0 = vcmask 64512   ;;  %s1084_s0 = inlined_call_operand.vmem [shape: f32[2,8,32], index: 0, kind: input, shape index: {}]   ;;  %s1085_s1 = inlined_call_operand.vmem [shape: f32[16,8], index: 1, kind: input, shape index: {}]   ;;  %s1086_s2 = inlined_call_operand.vmem [shape: f32[8,16], index: 2, kind: input, shape index: {}]   ;;  %s1087_s3 = inlined_call_operand.vmem [shape: f32[8,32], index: 3, kind: input, shape index: {}]   ;;  %s1088_s4 = inlined_call_operand.vmem [shape: f32[8,32], index: 4, kind: input, shape index: {}]   ;;  %s1089_s5 = inlined_call_operand.vmem [shape: f32[1,32], index: 5, kind: input, shape index: {}]   ;;  %s1090_s6 = inlined_call_operand.vmem [shape: f32[1,32], index: 6, kind: input, shape index: {}]   ;;  %s1091_s7 = inlined_call_operand.vmem [shape: f32[32,128], index: 7, kind: input, shape index: {}]   ;;  %s1092_s8 = inlined_call_operand.vmem [shape: f32[1,128], index: 8, kind: input, shape index: {}]   ;;  %s1093_s9 = inlined_call_operand.vmem [shape: f32[128,32], index: 9, kind: input, shape index: {}]   ;;  %s1094_s10 = inlined_call_operand.vmem [shape: f32[1,32], index: 10, kind: input, shape index: {}]   ;;  %s1095_s11 = inlined_call_operand.vmem [shape: f32[1,32], index: 11, kind: input, shape index: {}]   ;;  %s1096_s12 = inlined_call_operand.vmem [shape: f32[1,32], index: 12, kind: input, shape index: {}]   ;;  %s1097_s13 = inlined_call_operand.hbm [shape: f32[2,8,32], index: 13, kind: output, shape index: {}]  }
   0x1   :  { %v45_v0 = vld [vmem:[%s1084_s0] sm:$0xff]  ;;  %v48_v2 = vld [vmem:[%s1085_s1 + $0x8] sm:$0xff] }
   0x2   :  { %v47_v1 = vld [vmem:[%s1085_s1] sm:$0xff]  ;;  %725 = vmatprep.subr.mxu0 %v45_v0  ;;  %v46_v3 = vld [vmem:[%s1084_s0 + $0x8] sm:$0xff] }
   0x3   :  { %727 = vmatprep.mubr.msk.f32.mxu0 %vm49_vm0, %v47_v1 }
   0x4   :  { %18 = vsyncpa [#allocation3], 0  ;;  %726 = vmatpush3.msra.mxu0 %v45_v0  ;;  %v883_v4 = vmov 0.0|0.0   ;;  %vm884_vm1 = vmmov 0   ;;  %v885_v5 = vmov 0.0   ;;  %v206_v6 = vld [vmem:[%s1087_s3] sm:$0xff] }
   0x5   :  { %728 = vmatmul.mubr.msk.f32.vlgmr.msra.gmra.mrb[0].mxu0 %vm49_vm0, %v48_v2  ;;  %730 = vmatprep.subr.mxu0 %v46_v3  ;;  %v207_v7 = vld [vmem:[%s1088_s4] sm:$0xff]  ;;  %vm221_vm2 = vcmask 130048   ;;  %vm367_vm3 = vcmask 261120   ;;  %v412_v46 = vld [vmem:[%s1091_s7 + $0x8] sm:$0xff]  ;;  %v413_v48 = vld [vmem:[%s1091_s7 + $0x10] sm:$0xff]  ;;  %s886_s4 = smov [#allocation2]  }
   0x6   :  { %731 = vmatpush3.msra.mxu0 %v46_v3  ;;  %732 = vmatprep.mubr.msk.f32.mxu0 %vm49_vm0, %v47_v1  ;;  %v220_v25 = vld [vmem:[%s1086_s2] sm:$0xff]  ;;  %v414_v49 = vld [vmem:[%s1091_s7 + $0x18] sm:$0xff]  ;;  %v514_v52 = vld [vmem:[%s1093_s9 + $0x8] sm:$0xff]  ;;  %s664_s19 = sshll.u32 %s886_s4, 4  ;;  %s665_s19 = int_to_ptr.vmem [resolvable:$true] %s664_s19 }
   0x7   :  { %795 = vmatprep.subr.bf16.mxu0 %v883_v4  ;;  %v411_v45 = vld [vmem:[%s1091_s7] sm:$0xff]  ;;  %v805_v50 = vpack.c.bf16 %v414_v49, %v413_v48  ;;  %v515_v53 = vld [vmem:[%s1093_s9 + $0x10] sm:$0xff]  ;;  %v516_v55 = vld [vmem:[%s1093_s9 + $0x18] sm:$0xff]  ;;  %p864_p1 = scmp.lt.s32.totalorder %s665_s19, %s665_s19 }
   0x8   :  { %v801_v47 = vpack.c.bf16 %v412_v46, %v411_v45  ;;  %v513_v51 = vld [vmem:[%s1093_s9] sm:$0xff]  ;;  %v813_v56 = vpack.c.bf16 %v516_v55, %v515_v53  ;;  %v518_v58 = vld [vmem:[%s1093_s9 + $0x28] sm:$0xff] }
   0x9   :  { %733 = vmatmul.mubr.msk.f32.vlgmr.msra.gmra.mrb[2].mxu0 %vm49_vm0, %v48_v2  ;;  %v809_v54 = vpack.c.bf16 %v514_v52, %v513_v51  ;;  %v517_v57 = vld [vmem:[%s1093_s9 + $0x20] sm:$0xff] }
   0xa   :  { %739 = vmatprep.mubr.msk.f32.mxu0 %vm884_vm1, %v885_v5  ;;  %v817_v59 = vpack.c.bf16 %v518_v58, %v517_v57 }
   0xb   :  { %810 = vmatprep.subr.bf16.mxu1 %v809_v54 }
   0xc   :  { %812 = vmatpush3.bf16.msra.mxu1 %v809_v54 }
   0xd   :  { %814 = vmatprep.subr.bf16.mxu1 %v813_v56 }
  0x10   :  { %816 = vmatpush3.bf16.msra.mxu1 %v813_v56 }
  0x11   :  { %818 = vmatprep.subr.bf16.mxu1 %v817_v59 }
  0x14   :  { %820 = vmatpush3.bf16.msra.mxu1 %v817_v59 }
  0xd8   :  { %v729_v8 = vpop.f32.mrb[0].mxu0 }
  0xd9   :  { %v210_v9 = vmul.f32 %v729_v8, %v207_v7  ;;  %v216_v10 = vmul.f32 %v729_v8, %v206_v6  ;;  %v122_v11 = vpop.f32.mrb[1].mxu0 }
  0xda   :  { %v208_v12 = vmul.f32 %v206_v6, %v122_v11  ;;  %v214_v13 = vmul.f32 %v207_v7, %v122_v11 }
  0xdc   :  { %v212_v14 = vsub.f32 %v208_v12, %v210_v9  ;;  %v218_v15 = vadd.f32 %v216_v10, %v214_v13  ;;  %v734_v16 = vpop.f32.mrb[2].mxu0  ;;  %v519_v12 = vld [vmem:[%s1093_s9 + $0x30] sm:$0xff]  ;;  %v520_v13 = vld [vmem:[%s1093_s9 + $0x38] sm:$0xff] }
  0xdd   :  { %v211_v17 = vmul.f32 %v734_v16, %v207_v7  ;;  %v217_v18 = vmul.f32 %v734_v16, %v206_v6  ;;  %v197_v19 = vpop.f32.mrb[3].mxu0  ;;  %v522_v16 = vld [vmem:[%s1093_s9 + $0x48] sm:$0xff] }
  0xde   :  { %v796_v20 = vpack.c.bf16 %v218_v15, %v212_v14  ;;  %v209_v21 = vmul.f32 %v206_v6, %v197_v19  ;;  %v215_v22 = vmul.f32 %v207_v7, %v197_v19  ;;  %v821_v14 = vpack.c.bf16 %v520_v13, %v519_v12  ;;  %v521_v15 = vld [vmem:[%s1093_s9 + $0x40] sm:$0xff]  ;;  %v524_v19 = vld [vmem:[%s1093_s9 + $0x58] sm:$0xff] }
  0xe0   :  { %v213_v23 = vsub.f32 %v209_v21, %v211_v17  ;;  %v219_v24 = vadd.f32 %v217_v18, %v215_v22  ;;  %797 = vmatpush3.bf16.msra.mxu0 %v796_v20  ;;  %822 = vmatprep.subr.bf16.mxu1 %v821_v14  ;;  %v825_v17 = vpack.c.bf16 %v522_v16, %v521_v15  ;;  %v523_v18 = vld [vmem:[%s1093_s9 + $0x50] sm:$0xff]  ;;  %v525_v21 = vld [vmem:[%s1093_s9 + $0x60] sm:$0xff]  ;;  %v526_v22 = vld [vmem:[%s1093_s9 + $0x68] sm:$0xff] }
  0xe1   :  { %798 = vmatprep.subr.bf16.mxu0 %v883_v4  ;;  %824 = vmatpush3.bf16.msra.mxu1 %v821_v14  ;;  %v829_v20 = vpack.c.bf16 %v524_v19, %v523_v18 }
  0xe2   :  { %v799_v26 = vpack.c.bf16 %v219_v24, %v213_v23  ;;  %826 = vmatprep.subr.bf16.mxu1 %v825_v17  ;;  %v833_v23 = vpack.c.bf16 %v526_v22, %v525_v21  ;;  %v527_v24 = vld [vmem:[%s1093_s9 + $0x70] sm:$0xff] }
  0xe3   :  { %740 = vmatmul.mubr.msk.f32.vlgmr.msra.gmra.mrb[4].mxu0 %vm221_vm2, %v220_v25 }
  0xe4   :  { %800 = vmatpush3.bf16.msra.mxu0 %v799_v26  ;;  %746 = vmatprep.mubr.msk.f32.mxu0 %vm884_vm1, %v885_v5  ;;  %v682_v5 = vld [vmem:[%s1090_s6] ss:$0 sm:$0xff] }
  0xe5   :  { %802 = vmatprep.subr.bf16.mxu0 %v801_v47  ;;  %828 = vmatpush3.bf16.msra.mxu1 %v825_v17 }
  0xe6   :  { %830 = vmatprep.subr.bf16.mxu1 %v829_v20 }
  0xe7   :  { %747 = vmatmul.mubr.msk.f32.vlgmr.msra.gmra.mrb[6].mxu0 %vm221_vm2, %v220_v25  ;;  %v528_v25 = vld [vmem:[%s1093_s9 + $0x78] sm:$0xff] }
  0xe8   :  { %804 = vmatpush3.bf16.msra.mxu0 %v801_v47  ;;  %v837_v26 = vpack.c.bf16 %v528_v25, %v527_v24 }
  0xe9   :  { %806 = vmatprep.subr.bf16.mxu0 %v805_v50  ;;  %832 = vmatpush3.bf16.msra.mxu1 %v829_v20 }
  0xea   :  { %834 = vmatprep.subr.bf16.mxu1 %v833_v23 }
  0xec   :  { %808 = vmatpush3.bf16.msra.mxu0 %v805_v50 }
  0xed   :  { %836 = vmatpush3.bf16.msra.mxu1 %v833_v23 }
  0xee   :  { %838 = vmatprep.subr.bf16.mxu1 %v837_v26 }
  0xf1   :  { %840 = vmatpush3.bf16.msra.mxu1 %v837_v26 }
 0x1b6   :  { %v291_v27 = vpop.f32.mrb[4].mxu0 }
 0x1b7   :  { %v292_v28 = vadd.f32 %v291_v27, %v45_v0  ;;  %v741_v29 = vpop.f32.mrb[5].mxu0  ;;  %v683_v27 = vld [vmem:[%s1092_s8] ss:$0 sm:$0xff] }
 0x1b9   :  { %v368_v30 = vsel %vm367_vm3, %v292_v28, 0.0 }
 0x1ba   :  { %369 = vadd.xlane.f32.xlu0 %v368_v30  ;;  %v361_v31 = vpop.f32.mrb[6].mxu0 }
 0x1bb   :  { %v362_v32 = vadd.f32 %v361_v31, %v46_v3  ;;  %v748_v33 = vpop.f32.mrb[7].mxu0  ;;  %v681_v3 = vld [vmem:[%s1089_s5] ss:$0 sm:$0xff]  ;;  %s859_s5 = scalar_lea.vmem %s665_s19, 256 }
 0x1bc   :  { %p860_p0 = scmp.ne.s32.totalorder %s665_s19, %s859_s5  ;;  %p865_p2 = scmp.lt.s32.totalorder %s859_s5, %s859_s5 }
 0x1bd   :  { %v371_v34 = vsel %vm367_vm3, %v362_v32, 0.0 }
 0x1be   :  { %372 = vadd.xlane.f32.xlu0 %v371_v34  ;;  %p866_p3 = por %p865_p2, %p864_p1 }
 0x1c0   :  { %p867_p4 = pnand %p866_p3, %p860_p0 }
 0x247   :  { %v370_v35 = vpop.xlane.xlu0 %369 }
 0x248   :  { %v375_v36 = vmul.f32 0.03125, %v370_v35 }
 0x24a   :  { %v377_v37 = vsub.f32 %v292_v28, %v375_v36 }
 0x24b   :  { %v373_v38 = vpop.xlane.xlu0 %372 }
 0x24c   :  { %v376_v39 = vmul.f32 0.03125, %v373_v38  ;;  %v379_v40 = vmul.f32 %v377_v37, %v377_v37 }
 0x24e   :  { %v378_v41 = vsub.f32 %v362_v32, %v376_v39  ;;  %v381_v42 = vsel %vm367_vm3, %v379_v40, 0.0 }
 0x24f   :  { %382 = vadd.xlane.f32.xlu1 %v381_v42  ;;  %v686_v42 = vld [vmem:[%s1094_s10] ss:$0 sm:$0xff] }
 0x250   :  { %v380_v43 = vmul.f32 %v378_v41, %v378_v41 }
 0x252   :  { %v384_v44 = vsel %vm367_vm3, %v380_v43, 0.0 }
 0x253   :  { %385 = vadd.xlane.f32.xlu1 %v384_v44 }
 0x2dc   :  { %v383_v60 = vpop.xlane.xlu1 %382 }
 0x2dd   :  { %v387_v61 = vmul.f32 0.03125, %v383_v60 }
 0x2df   :  { %v389_v62 = vadd.f32 1e-12, %v387_v61 }
 0x2e0   :  { %v386_v63 = vpop.xlane.xlu1 %385 }
 0x2e1   :  { %847 = vrsqrt.f32 %v389_v62  ;;  %v388_v0 = vmul.f32 0.03125, %v386_v63 }
 0x2e3   :  { %v390_v1 = vadd.f32 1e-12, %v388_v0 }
 0x2e5   :  { %849 = vrsqrt.f32 %v390_v1 }
 0x2eb   :  { %v848_v2 = vpop.eup %847 }
 0x2ec   :  { %v393_v4 = vmul.f32 %v848_v2, %v377_v37 }
 0x2ee   :  { %v401_v6 = vmul.f32 %v681_v3, %v393_v4  ;;  %v687_v4 = vld [vmem:[%s1095_s11] ss:$0 sm:$0xff] }
 0x2ef   :  { %v850_v7 = vpop.eup %849 }
 0x2f0   :  { %v394_v8 = vmul.f32 %v850_v7, %v378_v41  ;;  %v409_v9 = vadd.f32 %v682_v5, %v401_v6 }
 0x2f2   :  { %v402_v10 = vmul.f32 %v681_v3, %v394_v8  ;;  %757 = vmatprep.mubr.msk.f32.mxu0 %vm367_vm3, %v409_v9  ;;  %v688_v8 = vld [vmem:[%s1096_s12] ss:$0 sm:$0xff] }
 0x2f4   :  { %v410_v11 = vadd.f32 %v682_v5, %v402_v10 }
 0x2f6   :  { %758 = vmatmul.mubr.msk.f32.vlgmr.msra.gmra.mrb[8].mxu0 %vm367_vm3, %v410_v11 }
 0x3c9   :  { %v759_v28 = vpop.f32.mrb[8].mxu0 }
 0x3ca   :  { %v500_v29 = vadd.f32 %v759_v28, %v683_v27  ;;  %v494_v30 = vpop.f32.mrb[9].mxu0 }
 0x3cb   :  { %v495_v31 = vadd.f32 %v683_v27, %v494_v30 }
 0x3cc   :  { %v506_v32 = vmul.f32 0.70710677, %v500_v29  ;;  %v504_v39 = vmul.f32 0.5, %v500_v29 }
 0x3cd   :  { %v505_v33 = vmul.f32 0.70710677, %v495_v31  ;;  %v503_v37 = vmul.f32 0.5, %v495_v31 }
 0x3ce   :  { %851 = verf.f32 %v506_v32 }
 0x3cf   :  { %853 = verf.f32 %v505_v33 }
 0x3d8   :  { %v852_v34 = vpop.eup %851 }
 0x3d9   :  { %v854_v35 = vpop.eup %853  ;;  %v510_v36 = vadd.f32 1.0, %v852_v34 }
 0x3da   :  { %v509_v38 = vadd.f32 1.0, %v854_v35 }
 0x3db   :  { %v512_v41 = vmul.f32 %v510_v36, %v504_v39 }
 0x3dc   :  { %v511_v40 = vmul.f32 %v509_v38, %v503_v37 }
 0x3de   :  { %792 = vmatprep.mubr.f32.mxu1 %v511_v40 }
 0x3df   :  { %793 = vmatmul.mubr.f32.vlgmr.msra.gmra.mrb[0].mxu1 %v512_v41 }
 0x4b2   :  { %v794_v43 = vpop.f32.mrb[0].mxu1 }
 0x4b3   :  { %v608_v44 = vadd.f32 %v794_v43, %v686_v42  ;;  %v602_v45 = vpop.f32.mrb[1].mxu1 }
 0x4b4   :  { %v603_v46 = vadd.f32 %v686_v42, %v602_v45 }
 0x4b5   :  { %v612_v47 = vadd.f32 %v608_v44, %v410_v11 }
 0x4b6   :  { %v611_v48 = vadd.f32 %v603_v46, %v409_v9 }
 0x4b7   :  { %v618_v49 = vsel %vm367_vm3, %v612_v47, 0.0 }
 0x4b8   :  { %619 = vadd.xlane.f32.xlu1 %v618_v49  ;;  %v615_v50 = vsel %vm367_vm3, %v611_v48, 0.0 }
 0x4b9   :  { %616 = vadd.xlane.f32.xlu0 %v615_v50 }
 0x545   :  { %v620_v51 = vpop.xlane.xlu1 %619 }
 0x546   :  { %v622_v52 = vmul.f32 0.03125, %v620_v51  ;;  %v617_v53 = vpop.xlane.xlu0 %616 }
 0x547   :  { %v621_v54 = vmul.f32 0.03125, %v617_v53 }
 0x548   :  { %v624_v55 = vsub.f32 %v612_v47, %v622_v52 }
 0x549   :  { %v623_v56 = vsub.f32 %v611_v48, %v621_v54 }
 0x54a   :  { %v626_v57 = vmul.f32 %v624_v55, %v624_v55 }
 0x54b   :  { %v625_v58 = vmul.f32 %v623_v56, %v623_v56 }
 0x54c   :  { %v630_v59 = vsel %vm367_vm3, %v626_v57, 0.0 }
 0x54d   :  { %631 = vadd.xlane.f32.xlu1 %v630_v59  ;;  %v627_v60 = vsel %vm367_vm3, %v625_v58, 0.0 }
 0x54e   :  { %628 = vadd.xlane.f32.xlu0 %v627_v60 }
 0x5da   :  { %v632_v61 = vpop.xlane.xlu1 %631 }
 0x5db   :  { %v634_v62 = vmul.f32 0.03125, %v632_v61  ;;  %v629_v63 = vpop.xlane.xlu0 %628 }
 0x5dc   :  { %v633_v0 = vmul.f32 0.03125, %v629_v63 }
 0x5dd   :  { %v636_v1 = vadd.f32 1e-12, %v634_v62 }
 0x5de   :  { %v635_v2 = vadd.f32 1e-12, %v633_v0 }
 0x5df   :  { %855 = vrsqrt.f32 %v636_v1 }
 0x5e0   :  { %857 = vrsqrt.f32 %v635_v2 }
 0x5e9   :  { %v856_v3 = vpop.eup %855 }
 0x5ea   :  { %v858_v5 = vpop.eup %857  ;;  %v640_v6 = vmul.f32 %v856_v3, %v624_v55 }
 0x5eb   :  { %v639_v7 = vmul.f32 %v858_v5, %v623_v56 }
 0x5ec   :  { %v648_v9 = vmul.f32 %v687_v4, %v640_v6 }
 0x5ed   :  { %v647_v10 = vmul.f32 %v687_v4, %v639_v7 }
 0x5ee   :  { %v656_v11 = vadd.f32 %v688_v8, %v648_v9 }
 0x5ef   :  { %v655_v12 = vadd.f32 %v688_v8, %v647_v10 }
 0x5f0   :  { %658 = vst.msk [vmem:[#allocation2 + $0x8] sm:$0xff] %vm367_vm3, %v656_v11 }
 0x5f1   :  { %657 = vst.msk [vmem:[#allocation2] sm:$0xff] %vm367_vm3, %v655_v12 }
 0x5f2   :  { %870 = shalt.err (!%p867_p4)
}
 0x5f3   :  { %s871_s20 = scalar_lea.hbm %s1097_s13, 256 }
 0x5f4   :  { %p872_p5 = scmp.ne.s32.totalorder %s1097_s13, %s871_s20  ;;  %p875_p6 = scmp.lt.u32.totalorder %s871_s20, %s1097_s13 }
 0x5f6   :  { %p877_p7 = pnand %p875_p6, %p872_p5 }
 0x5f8   :  { %880 = shalt.err (!%p877_p7)
}
 0x5f9   :  { %s887_s24 = smov 128   ;;  %s888_s25 = smov 8  }
 0x5fa   :  { %670 = dma.vmem_to_hbm [thread:$0]  %s665_s19, 256, %s1097_s13, [#allocation3], %s887_s24, %s887_s24, %s888_s25  }
 0x5fb   :  { %881 = dma.done.wait [#allocation3], 256  }
 0x5fc   :  { %882 = vsyncadd [#allocation3], 4294967040 }
 0x5fd   :  { %674 = vsyncpa [#allocation3], 1 }

</bundles_post_ra>
